<compile_context>
chip_gen: v6e
topology: v6e:2x2x1
jax: 0.10.0
libtpu: 0.0.40
codegen_flags: <defaults>
</compile_context>

<pallas_src>
import functools

import jax
import jax.numpy as jnp
from jax.experimental import pallas as pl
from jax.experimental.pallas import tpu as pltpu

HIDDEN = 128          # hidden width of the module (nn.Linear(input_dim, 128))
LANE = 128
SUBLANE = 8
VMEM_BUDGET = 40 * 1024 * 1024   # keep working set v7x-safe (64 MiB physical)


def _round_up(x, m):
    return pl.cdiv(x, m) * m


def _mlp_kernel(x_ref, w1_ref, b1_ref, w2_ref, b2_ref, o_ref):
    # Cast the streaming x tile once to the weight dtype (no-op for f32,
    # enables bf16 weights on v6e/v7x); accumulate in f32 on the MXU.
    x = x_ref[...].astype(w1_ref.dtype)
    h = jnp.dot(x, w1_ref[...], preferred_element_type=jnp.float32)
    h = jnp.maximum(h + b1_ref[...], 0.0)            # f32 epilogue (VPU)
    y = jnp.dot(h.astype(w2_ref.dtype), w2_ref[...],
                preferred_element_type=jnp.float32)
    y = jnp.maximum(y + b2_ref[...], 0.0)            # f32 epilogue
    o_ref[...] = y.astype(o_ref.dtype)               # cast only at the store


def _vmem_footprint(tb, input_dim, hidden, emb_dim, x_bytes, w_bytes, o_bytes):
    """VMEM bytes: Mosaic pads last dim to 128 lanes, 2nd-to-last to 8 sublanes."""
    kp = _round_up(input_dim, LANE)
    hp = _round_up(hidden, LANE)
    ep = _round_up(emb_dim, LANE)
    act = 2 * tb * kp * x_bytes + 2 * tb * ep * o_bytes   # double-buffered streams
    wts = kp * hp * w_bytes + hp * ep * w_bytes           # resident, single-buffered
    bias = SUBLANE * hp * 4 + SUBLANE * ep * 4            # resident f32 biases
    inter = tb * hp * 4                                   # hidden activations (f32)
    return act + wts + bias + inter


@functools.partial(jax.jit,
                   static_argnames=("block_b", "out_dtype", "vmem_limit_bytes"))
def state_embedding_forward(state, w1, b1, w2, b2, *,
                            block_b=1024,
                            out_dtype=None,
                            vmem_limit_bytes=None):
    """ReLU(ReLU(state @ w1 + b1) @ w2 + b2).

    state: (B, input_dim); w1: (input_dim, 128); b1: (128,);
    w2: (128, emb_dim);    b2: (emb_dim,).   Returns (B, emb_dim).
    """
    B, input_dim = state.shape
    hidden = w1.shape[1]
    emb_dim = w2.shape[1]
    if out_dtype is None:
        out_dtype = state.dtype

    x_bytes = state.dtype.itemsize
    w_bytes = w1.dtype.itemsize
    o_bytes = jnp.dtype(out_dtype).itemsize

    # ---- batch tile: multiple of 8 sublanes, <= block_b rows ----------------
    TB = _round_up(min(block_b, _round_up(B, SUBLANE)), SUBLANE)
    # v7x megacore: if one tile would cover the whole batch, split it so the
    # "parallel" grid axis has >= 2 steps and both TensorCores get work.
    if pl.cdiv(B, TB) == 1 and B > SUBLANE:
        TB = _round_up(pl.cdiv(B, 2), SUBLANE)
    # Shrink the tile until the (double-buffered) working set fits the budget.
    while (TB > SUBLANE and
           _vmem_footprint(TB, input_dim, hidden, emb_dim,
                           x_bytes, w_bytes, o_bytes) > VMEM_BUDGET):
        TB = _round_up(TB // 2, SUBLANE)

    num_blocks = pl.cdiv(B, TB)   # ragged last block: rows are independent,
                                  # OOB output rows are masked off by Pallas.

    if vmem_limit_bytes is None:
        need = _vmem_footprint(TB, input_dim, hidden, emb_dim,
                               x_bytes, w_bytes, o_bytes)
        vmem_limit_bytes = int(min(max(2 * need, 32 * 1024 * 1024),
                                   60 * 1024 * 1024))

    # Tiny resident (1, N) f32 bias rows.
    b1_2d = b1.reshape(1, hidden).astype(jnp.float32)
    b2_2d = b2.reshape(1, emb_dim).astype(jnp.float32)

    def _resident(shape):
        # Constant index_map -> DMA'd once and kept in VMEM for the whole
        # batch loop; Buffered(1) drops the useless second buffer.
        return pl.BlockSpec(shape, lambda i: (0, 0),
                            pipeline_mode=pl.Buffered(1))

    flops = 2 * B * hidden * (input_dim + emb_dim)
    bytes_accessed = (state.size * x_bytes
                      + w1.size * w_bytes + w2.size * w_bytes
                      + (b1.size + b2.size) * 4
                      + B * emb_dim * o_bytes)

    return pl.pallas_call(
        _mlp_kernel,
        out_shape=jax.ShapeDtypeStruct((B, emb_dim), out_dtype),
        grid_spec=pl.GridSpec(
            grid=(num_blocks,),
            in_specs=[
                # streaming input: unpadded, full-extent last dim,
                # double-buffered across batch tiles
                pl.BlockSpec((TB, input_dim), lambda i: (i, 0)),
                _resident((input_dim, hidden)),
                _resident((1, hidden)),
                _resident((hidden, emb_dim)),
                _resident((1, emb_dim)),
            ],
            # unpadded output: no post-slice, no extra HBM round trip
            out_specs=pl.BlockSpec((TB, emb_dim), lambda i: (i, 0)),
        ),
        compiler_params=pltpu.CompilerParams(
            dimension_semantics=("parallel",),   # rows independent -> megacore
            vmem_limit_bytes=vmem_limit_bytes,
        ),
        cost_estimate=pl.CostEstimate(
            flops=flops, transcendentals=0, bytes_accessed=bytes_accessed),
    )(state, w1, b1_2d, w2, b2_2d)


def _ref_forward(state, w1, b1, w2, b2):
    h = jnp.maximum(state @ w1 + b1, 0.0)
    return jnp.maximum(h @ w2 + b2, 0.0)


if __name__ == "__main__":
    key = jax.random.PRNGKey(0)
    B, input_dim, embedding_dim = 8, 32, 32

    k_x, k_w1, k_b1, k_w2, k_b2 = jax.random.split(key, 5)
    state = jax.random.normal(k_x, (B, input_dim), dtype=jnp.float32)

    # Deterministic synthetic params (PyTorch-style uniform init bounds).
    bound1 = 1.0 / (input_dim ** 0.5)
    w1 = jax.random.uniform(k_w1, (input_dim, HIDDEN), jnp.float32,
                            minval=-bound1, maxval=bound1)
    b1 = jax.random.uniform(k_b1, (HIDDEN,), jnp.float32,
                            minval=-bound1, maxval=bound1)
    bound2 = 1.0 / (HIDDEN ** 0.5)
    w2 = jax.random.uniform(k_w2, (HIDDEN, embedding_dim), jnp.float32,
                            minval=-bound2, maxval=bound2)
    b2 = jax.random.uniform(k_b2, (embedding_dim,), jnp.float32,
                            minval=-bound2, maxval=bound2)

    out = state_embedding_forward(state, w1, b1, w2, b2)
    out = jax.block_until_ready(out)

    ref = _ref_forward(state, w1, b1, w2, b2)
    assert out.shape == (B, embedding_dim)
    assert out.dtype == jnp.float32
    assert jnp.allclose(out, ref, atol=1e-5, rtol=1e-5), "mismatch vs reference"

    print("KERNEL_OK")
</pallas_src>

<mosaic_0001>
module attributes {stable_mosaic.version = 11 : i64} {
  func.func @_mlp_kernel(%arg0: i32, %arg1: memref<8x32xf32, #tpu.memory_space<vmem>>, %arg2: memref<32x128xf32, #tpu.memory_space<vmem>>, %arg3: memref<1x128xf32, #tpu.memory_space<vmem>>, %arg4: memref<128x32xf32, #tpu.memory_space<vmem>>, %arg5: memref<1x32xf32, #tpu.memory_space<vmem>>, %arg6: memref<8x32xf32, #tpu.memory_space<vmem>>) attributes {dimension_semantics = [#tpu.dimension_semantics<parallel>], iteration_bounds = array<i64: 1>, scalar_prefetch = 0 : i64, scratch_operands = 0 : i64, tpu.core_type = #tpu.core_type<tc>, window_params = [{transform_indices = @transform_0, window_bounds = array<i64: 8, 32>}, {pipeline_mode = #tpu.pipeline_mode<synchronous>, transform_indices = @transform_1, window_bounds = array<i64: 32, 128>}, {pipeline_mode = #tpu.pipeline_mode<synchronous>, transform_indices = @transform_2, window_bounds = array<i64: 1, 128>}, {pipeline_mode = #tpu.pipeline_mode<synchronous>, transform_indices = @transform_3, window_bounds = array<i64: 128, 32>}, {pipeline_mode = #tpu.pipeline_mode<synchronous>, transform_indices = @transform_4, window_bounds = array<i64: 1, 32>}, {transform_indices = @transform_5, window_bounds = array<i64: 8, 32>}]} {
    %c0 = arith.constant 0 : index
    %c0_0 = arith.constant 0 : index
    %0 = vector.load %arg1[%c0, %c0_0] : memref<8x32xf32, #tpu.memory_space<vmem>>, vector<8x32xf32>
    %c0_1 = arith.constant 0 : index
    %c0_2 = arith.constant 0 : index
    %1 = vector.load %arg2[%c0_1, %c0_2] : memref<32x128xf32, #tpu.memory_space<vmem>>, vector<32x128xf32>
    %cst = arith.constant dense<0.000000e+00> : vector<8x128xf32>
    %2 = tpu.matmul %0, %1, %cst {dimension_numbers = #tpu.dot_dimension_numbers<[1], [0], [0], [1], [0, 0, 1, 1], [], []>} : vector<8x32xf32>, vector<32x128xf32>, vector<8x128xf32> -> vector<8x128xf32>
    %c0_3 = arith.constant 0 : index
    %c0_4 = arith.constant 0 : index
    %3 = vector.load %arg3[%c0_3, %c0_4] : memref<1x128xf32, #tpu.memory_space<vmem>>, vector<1x128xf32>
    %4 = vector.broadcast %3 : vector<1x128xf32> to vector<8x128xf32>
    %5 = arith.addf %2, %4 : vector<8x128xf32>
    %cst_5 = arith.constant 0.000000e+00 : f32
    %6 = vector.broadcast %cst_5 : f32 to vector<8x128xf32>
    %7 = arith.maximumf %5, %6 : vector<8x128xf32>
    %c0_6 = arith.constant 0 : index
    %c0_7 = arith.constant 0 : index
    %8 = vector.load %arg4[%c0_6, %c0_7] : memref<128x32xf32, #tpu.memory_space<vmem>>, vector<128x32xf32>
    %cst_8 = arith.constant dense<0.000000e+00> : vector<8x32xf32>
    %9 = tpu.matmul %7, %8, %cst_8 {dimension_numbers = #tpu.dot_dimension_numbers<[1], [0], [0], [1], [0, 0, 1, 1], [], []>} : vector<8x128xf32>, vector<128x32xf32>, vector<8x32xf32> -> vector<8x32xf32>
    %c0_9 = arith.constant 0 : index
    %c0_10 = arith.constant 0 : index
    %10 = vector.load %arg5[%c0_9, %c0_10] : memref<1x32xf32, #tpu.memory_space<vmem>>, vector<1x32xf32>
    %11 = vector.broadcast %10 : vector<1x32xf32> to vector<8x32xf32>
    %12 = arith.addf %9, %11 : vector<8x32xf32>
    %cst_11 = arith.constant 0.000000e+00 : f32
    %13 = vector.broadcast %cst_11 : f32 to vector<8x32xf32>
    %14 = arith.maximumf %12, %13 : vector<8x32xf32>
    %c0_12 = arith.constant 0 : index
    %c0_13 = arith.constant 0 : index
    %15 = vector.load %arg6[%c0_12, %c0_13] : memref<8x32xf32, #tpu.memory_space<vmem>>, vector<8x32xf32>
    tpu.vector_store %arg6[%c0_12, %c0_13], %14 {strides = array<i32>} : memref<8x32xf32, #tpu.memory_space<vmem>>, vector<8x32xf32>,
    return
  }
  func.func @transform_0(%arg0: i32) -> (i32, i32) {
    %c0_i32 = arith.constant 0 : i32
    %c0_i32_0 = arith.constant 0 : i32
    return %arg0, %c0_i32 : i32, i32
  }
  func.func @transform_1(%arg0: i32) -> (i32, i32) {
    %c0_i32 = arith.constant 0 : i32
    %c0_i32_0 = arith.constant 0 : i32
    %c0_i32_1 = arith.constant 0 : i32
    return %c0_i32, %c0_i32_0 : i32, i32
  }
  func.func @transform_2(%arg0: i32) -> (i32, i32) {
    %c0_i32 = arith.constant 0 : i32
    %c0_i32_0 = arith.constant 0 : i32
    %c0_i32_1 = arith.constant 0 : i32
    return %c0_i32, %c0_i32_0 : i32, i32
  }
  func.func @transform_3(%arg0: i32) -> (i32, i32) {
    %c0_i32 = arith.constant 0 : i32
    %c0_i32_0 = arith.constant 0 : i32
    %c0_i32_1 = arith.constant 0 : i32
    return %c0_i32, %c0_i32_0 : i32, i32
  }
  func.func @transform_4(%arg0: i32) -> (i32, i32) {
    %c0_i32 = arith.constant 0 : i32
    %c0_i32_0 = arith.constant 0 : i32
    %c0_i32_1 = arith.constant 0 : i32
    return %c0_i32, %c0_i32_0 : i32, i32
  }
  func.func @transform_5(%arg0: i32) -> (i32, i32) {
    %c0_i32 = arith.constant 0 : i32
    %c0_i32_0 = arith.constant 0 : i32
    return %arg0, %c0_i32 : i32, i32
  }
}

</mosaic_0001>

<bundles_post_ra>
// kernel: state_embedding_forward.1
= control target key start
LH: loop header
LB: loop body
LE: loop exit
PB: predicated region body
PF: predicated region fallthrough
CT: control target
= control target key end

     0   :  { %v313_v1 = vmov 0.0   ;;  %vm314_vm0 = vmmov 0   ;;  %vm33_vm1 = vcmask 261120   ;;  %s444_s0 = inlined_call_operand.vmem [shape: f32[8,32], index: 0, kind: input, shape index: {}]   ;;  %s445_s1 = inlined_call_operand.vmem [shape: f32[32,128], index: 1, kind: input, shape index: {}]   ;;  %s446_s2 = inlined_call_operand.vmem [shape: f32[1,128], index: 2, kind: input, shape index: {}]   ;;  %s447_s3 = inlined_call_operand.vmem [shape: f32[128,32], index: 3, kind: input, shape index: {}]   ;;  %s448_s4 = inlined_call_operand.vmem [shape: f32[1,32], index: 4, kind: input, shape index: {}]   ;;  %s449_s5 = inlined_call_operand.hbm [shape: f32[8,32], index: 5, kind: output, shape index: {}]  }
   0x1   :  { %v25_v0 = vld [vmem:[%s445_s1 + $0x18] sm:$0xff]  ;;  %242 = vmatprep.subr.mxu0 %v313_v1  ;;  %v24_v2 = vld [vmem:[%s445_s1 + $0x10] sm:$0xff]  ;;  %250 = vmatprep.mubr.msk.f32.mxu0 %vm314_vm0, %v313_v1  ;;  %v23_v5 = vld [vmem:[%s445_s1 + $0x8] sm:$0xff] }
   0x2   :  { %v123_v3 = vld [vmem:[%s447_s3 + $0x78] sm:$0xff]  ;;  %243 = vmatpush3.msra.mxu0 %v25_v0  ;;  %253 = vmatprep.subr.mxu1 %v313_v1  ;;  %v122_v4 = vld [vmem:[%s447_s3 + $0x70] sm:$0xff]  ;;  %v121_v6 = vld [vmem:[%s447_s3 + $0x68] sm:$0xff] }
   0x3   :  { %244 = vmatprep.subr.mxu0 %v313_v1  ;;  %254 = vmatpush3.msra.mxu1 %v123_v3  ;;  %v22_v7 = vld [vmem:[%s445_s1] sm:$0xff] }
   0x4   :  { %245 = vmatpush3.msra.mxu0 %v24_v2  ;;  %255 = vmatprep.subr.mxu1 %v313_v1  ;;  %v21_v8 = vld [vmem:[%s444_s0] sm:$0xff] }
   0x5   :  { %246 = vmatprep.subr.mxu0 %v313_v1  ;;  %256 = vmatpush3.msra.mxu1 %v122_v4  ;;  %v120_v9 = vld [vmem:[%s447_s3 + $0x60] sm:$0xff] }
   0x6   :  { %247 = vmatpush3.msra.mxu0 %v23_v5  ;;  %257 = vmatprep.subr.mxu1 %v313_v1 }
   0x7   :  { %10 = vsyncpa [#allocation3], 0  ;;  %248 = vmatprep.subr.mxu0 %v313_v1  ;;  %258 = vmatpush3.msra.mxu1 %v121_v6  ;;  %v119_v10 = vld [vmem:[%s447_s3 + $0x58] sm:$0xff]  ;;  %v118_v11 = vld [vmem:[%s447_s3 + $0x50] sm:$0xff]  ;;  %s315_s11 = smov [#allocation2]  }
   0x8   :  { %249 = vmatpush3.msra.mxu0 %v22_v7  ;;  %259 = vmatprep.subr.mxu1 %v313_v1  ;;  %v117_v12 = vld [vmem:[%s447_s3 + $0x48] sm:$0xff]  ;;  %v116_v13 = vld [vmem:[%s447_s3 + $0x40] sm:$0xff]  ;;  %v115_v14 = vld [vmem:[%s447_s3 + $0x38] sm:$0xff]  ;;  %s209_s0 = sshll.u32 %s315_s11, 4  ;;  %s210_s0 = int_to_ptr.vmem [resolvable:$true] %s209_s0 }
   0x9   :  { %251 = vmatmul.mubr.msk.f32.vlgmr.msra.gmra.mxu0 %vm33_vm1, %v21_v8  ;;  %260 = vmatpush3.msra.mxu1 %v120_v9  ;;  %v114_v15 = vld [vmem:[%s447_s3 + $0x30] sm:$0xff]  ;;  %v113_v16 = vld [vmem:[%s447_s3 + $0x28] sm:$0xff]  ;;  %v112_v17 = vld [vmem:[%s447_s3 + $0x20] sm:$0xff]  ;;  %p296_p1 = scmp.lt.s32.totalorder %s210_s0, %s210_s0 }
   0xa   :  { %261 = vmatprep.subr.mxu1 %v313_v1  ;;  %285 = vmatprep.mubr.msk.f32.mxu1 %vm314_vm0, %v313_v1  ;;  %v111_v18 = vld [vmem:[%s447_s3 + $0x18] sm:$0xff]  ;;  %v110_v19 = vld [vmem:[%s447_s3 + $0x10] sm:$0xff]  ;;  %v109_v20 = vld [vmem:[%s447_s3 + $0x8] sm:$0xff] }
   0xb   :  { %262 = vmatpush3.msra.mxu1 %v119_v10  ;;  %v108_v21 = vld [vmem:[%s447_s3] sm:$0xff]  ;;  %s291_s3 = scalar_lea.vmem %s210_s0, 128 }
   0xc   :  { %263 = vmatprep.subr.mxu1 %v313_v1  ;;  %v217_v22 = vld [vmem:[%s446_s2] ss:$0 sm:$0xff]  ;;  %p292_p0 = scmp.ne.s32.totalorder %s210_s0, %s291_s3  ;;  %p297_p2 = scmp.lt.s32.totalorder %s291_s3, %s291_s3 }
   0xd   :  { %264 = vmatpush3.msra.mxu1 %v118_v11  ;;  %v219_v27 = vld [vmem:[%s448_s4] ss:$0 sm:$0xff] }
   0xe   :  { %265 = vmatprep.subr.mxu1 %v313_v1  ;;  %p298_p3 = por %p297_p2, %p296_p1 }
   0xf   :  { %266 = vmatpush3.msra.mxu1 %v117_v12 }
  0x10   :  { %267 = vmatprep.subr.mxu1 %v313_v1  ;;  %p299_p4 = pnand %p298_p3, %p292_p0 }
  0x11   :  { %268 = vmatpush3.msra.mxu1 %v116_v13 }
  0x12   :  { %269 = vmatprep.subr.mxu1 %v313_v1 }
  0x13   :  { %270 = vmatpush3.msra.mxu1 %v115_v14 }
  0x14   :  { %271 = vmatprep.subr.mxu1 %v313_v1 }
  0x15   :  { %272 = vmatpush3.msra.mxu1 %v114_v15 }
  0x16   :  { %273 = vmatprep.subr.mxu1 %v313_v1 }
  0x17   :  { %274 = vmatpush3.msra.mxu1 %v113_v16 }
  0x18   :  { %275 = vmatprep.subr.mxu1 %v313_v1 }
  0x19   :  { %276 = vmatpush3.msra.mxu1 %v112_v17 }
  0x1a   :  { %277 = vmatprep.subr.mxu1 %v313_v1 }
  0x1b   :  { %278 = vmatpush3.msra.mxu1 %v111_v18 }
  0x1c   :  { %279 = vmatprep.subr.mxu1 %v313_v1 }
  0x1d   :  { %280 = vmatpush3.msra.mxu1 %v110_v19 }
  0x1e   :  { %281 = vmatprep.subr.mxu1 %v313_v1 }
  0x1f   :  { %282 = vmatpush3.msra.mxu1 %v109_v20 }
  0x20   :  { %283 = vmatprep.subr.mxu1 %v313_v1 }
  0x21   :  { %284 = vmatpush3.msra.mxu1 %v108_v21 }
  0xc9   :  { %v103_v23 = vpop.f32.mrf.mxu0 }
  0xca   :  { %v104_v24 = vadd.f32 %v217_v22, %v103_v23 }
  0xcb   :  { %v252_v25 = vpop.f32.mrf.mxu0 }
  0xcc   :  { %v107_v26 = vmax.f32 %v104_v24, 0.0 }
  0xce   :  { %286 = vmatmul.mubr.f32.vlgmr.msra.gmra.mxu1 %v107_v26 }
 0x18e   :  { %v197_v28 = vpop.f32.mrf.mxu1 }
 0x18f   :  { %v198_v29 = vadd.f32 %v219_v27, %v197_v28 }
 0x190   :  { %v287_v30 = vpop.f32.mrf.mxu1 }
 0x191   :  { %v201_v31 = vmax.f32 %v198_v29, 0.0 }
 0x193   :  { %202 = vst.msk [vmem:[#allocation2] sm:$0xff] %vm33_vm1, %v201_v31 }
 0x194   :  { %302 = shalt.err (!%p299_p4)
}
 0x195   :  { %212 = dma.vmem_to_hbm [thread:$0]  %s210_s0, 128, %s449_s5, [#allocation3]  }
 0x196   :  { %311 = dma.done.wait [#allocation3], 128  }
 0x197   :  { %312 = vsyncadd [#allocation3], 4294967168 }
 0x198   :  { %216 = vsyncpa [#allocation3], 1 }

</bundles_post_ra>
